<compile_context>
chip_gen: v6e
topology: v6e:2x2x1
jax: 0.10.0
libtpu: 0.0.40
codegen_flags: <defaults>
</compile_context>

<pallas_src>
import jax
import jax.numpy as jnp
from jax import lax
from jax.experimental import pallas as pl
from jax.experimental.pallas import tpu as pltpu

N_EMBD = 384
BLOCK_SIZE = 64   # max sequence length allowed by the causal mask buffer
LANE = 128        # TPU lane width
NEG_BIG = -1e30   # finite "masked" additive bias (no inf-inf NaN hazard)


def _head_kernel(x_ref, w_ref, bias_ref, o_ref):
    # x_ref: (Bt, T, C) bf16 | w_ref: (C, 3*Hp) bf16 | bias_ref: (T, T) f32
    # o_ref: (Bt, T, Hp) where Hp = head_size rounded up to 128 lanes.
    Bt, T, C = x_ref.shape
    Hp = o_ref.shape[-1]

    x = x_ref[...]
    w = w_ref[...]

    # Fused QKV projection: one (Bt*T, C) @ (C, 3*Hp) MXU matmul, f32 accumulate.
    # T is a multiple of 8, so the (Bt, T, C) -> (Bt*T, C) flatten is
    # layout-preserving (no data movement in VMEM).
    qkv = jnp.dot(x.reshape(Bt * T, C), w, preferred_element_type=jnp.float32)
    qkv = qkv.reshape(Bt, T, 3 * Hp)

    # q/k/v start on 128-lane tile boundaries -> plain tile slices, no XLU
    # relayout. Cast to bf16 to keep the MXU at full rate; accumulation is f32.
    q = qkv[:, :, 0 * Hp:1 * Hp].astype(jnp.bfloat16)   # query weight pre-scaled by H**-0.5
    k = qkv[:, :, 1 * Hp:2 * Hp].astype(jnp.bfloat16)
    v = qkv[:, :, 2 * Hp:3 * Hp].astype(jnp.bfloat16)

    # Attention scores: contract last dims directly (no materialized k.T).
    s = lax.dot_general(q, k,
                        dimension_numbers=(((2,), (2,)), ((0,), (0,))),
                        preferred_element_type=jnp.float32)          # (Bt, T, T)

    # Precomputed additive causal bias: 0 on/below the diagonal, -1e30 above.
    s = s + bias_ref[...]

    # Numerically stable softmax in f32; normalizer via EUP approx reciprocal.
    s = s - jnp.max(s, axis=-1, keepdims=True)
    p = jnp.exp(s)
    p = p * pl.reciprocal(jnp.sum(p, axis=-1, keepdims=True), approx=True)

    # dropout: eval mode -> identity.

    out = lax.dot_general(p.astype(jnp.bfloat16), v,
                          dimension_numbers=(((2,), (1,)), ((0,), (0,))),
                          preferred_element_type=jnp.float32)        # (Bt, T, Hp)
    o_ref[...] = out.astype(o_ref.dtype)


def _pick_batch_tile(B, T):
    """Pick Bt so the grid has >=2 steps when possible (pipelining + v7x 2 TCs)
    while targeting ~256 matmul rows per tile; per-step VMEM stays far below
    the 16 MiB v5e scoped default at these shapes."""
    bt = max(1, min(B, max(1, 256 // max(T, 1))))
    if B >= 2:
        bt = min(bt, max(1, B // 2))
    while B % bt != 0:
        bt -= 1
    return bt


def head_forward(x, w_key, w_query, w_value, *, batch_tile=None,
                 compute_dtype=jnp.bfloat16):
    """x: (B, T, C); w_*: (C, H). Returns (B, T, H). Eval-mode Head forward."""
    B, T, C = x.shape
    assert C == N_EMBD
    assert T <= BLOCK_SIZE
    assert T % 8 == 0, "T must be a multiple of 8 (sublane) for the fused projection"
    H = w_key.shape[1]
    Hp = ((H + LANE - 1) // LANE) * LANE   # lane-aligned head width

    # Fold 1/sqrt(H) into the query weight, pad each projection to Hp columns
    # (so q/k/v live on 128-lane tile boundaries), fuse into one (C, 3*Hp)
    # weight, and cast operands to bf16 (halves HBM bytes, full-rate MXU).
    scale = jnp.float32(H) ** jnp.float32(-0.5)
    def prep(w, s=None):
        w32 = w.astype(jnp.float32)
        if s is not None:
            w32 = w32 * s
        w32 = jnp.pad(w32, ((0, 0), (0, Hp - H)))
        return w32.astype(compute_dtype)
    w_qkv = jnp.concatenate([prep(w_query, scale), prep(w_key), prep(w_value)],
                            axis=1)                                  # (C, 3*Hp)
    x_c = x.astype(compute_dtype)

    # Precomputed additive causal bias (finite, NaN-safe), resident across grid.
    tril = jnp.tril(jnp.ones((T, T), dtype=bool))
    bias = jnp.where(tril, 0.0, NEG_BIG).astype(jnp.float32)

    Bt = _pick_batch_tile(B, T) if batch_tile is None else batch_tile
    assert B % Bt == 0

    grid_spec = pltpu.PrefetchScalarGridSpec(
        num_scalar_prefetch=0,
        grid=(B // Bt,),
        in_specs=[
            pl.BlockSpec((Bt, T, C), lambda b: (b, 0, 0)),
            pl.BlockSpec((C, 3 * Hp), lambda b: (0, 0)),   # constant -> fetched once
            pl.BlockSpec((T, T), lambda b: (0, 0)),        # constant -> fetched once
        ],
        out_specs=pl.BlockSpec((Bt, T, Hp), lambda b: (b, 0, 0)),
    )

    out_padded = pl.pallas_call(
        _head_kernel,
        out_shape=jax.ShapeDtypeStruct((B, T, Hp), x.dtype),
        grid_spec=grid_spec,
        compiler_params=pltpu.CompilerParams(
            dimension_semantics=("parallel",),
        ),
    )(x_c, w_qkv, bias)

    # Lane-dense (Hp=128-wide) unmasked stores in-kernel; slice the real head
    # columns here (layout plumbing, not compute).
    return out_padded[..., :H] if Hp != H else out_padded


def _reference(x, w_key, w_query, w_value):
    """Pure-JAX f32 reference replicating the PyTorch forward (eval mode)."""
    k = x @ w_key
    q = x @ w_query
    v = x @ w_value
    wei = (q @ jnp.swapaxes(k, -2, -1)) * (k.shape[-1] ** -0.5)
    T = x.shape[1]
    mask = jnp.tril(jnp.ones((T, T), dtype=bool))
    wei = jnp.where(mask[None, :, :], wei, -jnp.inf)
    wei = jax.nn.softmax(wei, axis=-1)
    return wei @ v


if __name__ == "__main__":
    B, T, C = 2, 8, N_EMBD
    head_size = 32

    key = jax.random.PRNGKey(0)
    kx, kk, kq, kv = jax.random.split(key, 4)

    x = jax.random.normal(kx, (B, T, C), dtype=jnp.float32)
    # nn.Linear(n_embd, head_size, bias=False): weight (head_size, n_embd);
    # we store the transpose (n_embd, head_size), scaled like PyTorch's init.
    bound = 1.0 / (C ** 0.5)
    w_key = jax.random.uniform(kk, (C, head_size), jnp.float32, -bound, bound)
    w_query = jax.random.uniform(kq, (C, head_size), jnp.float32, -bound, bound)
    w_value = jax.random.uniform(kv, (C, head_size), jnp.float32, -bound, bound)

    out = head_forward(x, w_key, w_query, w_value)
    out = jax.block_until_ready(out)

    ref = _reference(x, w_key, w_query, w_value)
    assert out.shape == (B, T, head_size)
    # Tolerance covers bf16 MXU operands (f32 accumulate / f32 softmax) and the
    # approx (EUP) softmax reciprocal; structural errors would be >> 2e-2.
    assert jnp.allclose(out, ref, atol=2e-2, rtol=2e-2), "mismatch vs reference"

    print("KERNEL_OK")
</pallas_src>

<mosaic_0001>
module attributes {stable_mosaic.version = 11 : i64} {
  func.func @_head_kernel(%arg0: i32, %arg1: memref<1x8x384xbf16, #tpu.memory_space<vmem>>, %arg2: memref<384x384xbf16, #tpu.memory_space<vmem>>, %arg3: memref<8x8xf32, #tpu.memory_space<vmem>>, %arg4: memref<1x8x128xf32, #tpu.memory_space<vmem>>) attributes {dimension_semantics = [#tpu.dimension_semantics<parallel>], iteration_bounds = array<i64: 2>, scalar_prefetch = 0 : i64, scratch_operands = 0 : i64, tpu.core_type = #tpu.core_type<tc>, window_params = [{transform_indices = @transform_0, window_bounds = array<i64: 1, 8, 384>}, {pipeline_mode = #tpu.pipeline_mode<synchronous>, transform_indices = @transform_1, window_bounds = array<i64: 384, 384>}, {pipeline_mode = #tpu.pipeline_mode<synchronous>, transform_indices = @transform_2, window_bounds = array<i64: 8, 8>}, {transform_indices = @transform_3, window_bounds = array<i64: 1, 8, 128>}]} {
    %c0 = arith.constant 0 : index
    %c0_0 = arith.constant 0 : index
    %c0_1 = arith.constant 0 : index
    %0 = vector.load %arg1[%c0, %c0_0, %c0_1] : memref<1x8x384xbf16, #tpu.memory_space<vmem>>, vector<1x8x384xbf16>
    %c0_2 = arith.constant 0 : index
    %c0_3 = arith.constant 0 : index
    %1 = vector.load %arg2[%c0_2, %c0_3] : memref<384x384xbf16, #tpu.memory_space<vmem>>, vector<384x384xbf16>
    %2 = vector.shape_cast %0 : vector<1x8x384xbf16> to vector<8x384xbf16>
    %cst = arith.constant dense<0.000000e+00> : vector<8x384xf32>
    %3 = tpu.matmul %2, %1, %cst {dimension_numbers = #tpu.dot_dimension_numbers<[1], [0], [0], [1], [0, 0, 1, 1], [], []>} : vector<8x384xbf16>, vector<384x384xbf16>, vector<8x384xf32> -> vector<8x384xf32>
    %4 = vector.shape_cast %3 : vector<8x384xf32> to vector<1x8x384xf32>
    %5 = vector.extract_strided_slice %4 {offsets = [0, 0, 0], sizes = [1, 8, 128], strides = [1, 1, 1]} : vector<1x8x384xf32> to vector<1x8x128xf32>
    %6 = arith.truncf %5 : vector<1x8x128xf32> to vector<1x8x128xbf16>
    %7 = vector.extract_strided_slice %4 {offsets = [0, 0, 128], sizes = [1, 8, 128], strides = [1, 1, 1]} : vector<1x8x384xf32> to vector<1x8x128xf32>
    %8 = arith.truncf %7 : vector<1x8x128xf32> to vector<1x8x128xbf16>
    %9 = vector.extract_strided_slice %4 {offsets = [0, 0, 256], sizes = [1, 8, 128], strides = [1, 1, 1]} : vector<1x8x384xf32> to vector<1x8x128xf32>
    %10 = arith.truncf %9 : vector<1x8x128xf32> to vector<1x8x128xbf16>
    %cst_4 = arith.constant dense<0.000000e+00> : vector<1x8x8xf32>
    %11 = tpu.matmul %6, %8, %cst_4 {dimension_numbers = #tpu.dot_dimension_numbers<[2], [2], [1], [1], [0, 0, 0, 1, 1, 1], [0], [0]>} : vector<1x8x128xbf16>, vector<1x8x128xbf16>, vector<1x8x8xf32> -> vector<1x8x8xf32>
    %c0_5 = arith.constant 0 : index
    %c0_6 = arith.constant 0 : index
    %12 = vector.load %arg3[%c0_5, %c0_6] : memref<8x8xf32, #tpu.memory_space<vmem>>, vector<8x8xf32>
    %13 = vector.shape_cast %12 : vector<8x8xf32> to vector<1x8x8xf32>
    %14 = arith.addf %11, %13 : vector<1x8x8xf32>
    %cst_7 = arith.constant dense<0xFF800000> : vector<1x8xf32>
    %15 = vector.multi_reduction <maximumf>, %14, %cst_7 [2] : vector<1x8x8xf32> to vector<1x8xf32>
    %16 = vector.shape_cast %15 : vector<1x8xf32> to vector<1x8x1xf32>
    %17 = vector.broadcast %16 : vector<1x8x1xf32> to vector<1x8x8xf32>
    %18 = arith.subf %14, %17 : vector<1x8x8xf32>
    %19 = math.exp %18 : vector<1x8x8xf32>
    %cst_8 = arith.constant dense<0.000000e+00> : vector<1x8xf32>
    %20 = vector.multi_reduction <add>, %19, %cst_8 [2] : vector<1x8x8xf32> to vector<1x8xf32>
    %21 = vector.shape_cast %20 : vector<1x8xf32> to vector<1x8x1xf32>
    %22 = tpu.reciprocal %21 {approx = true} : vector<1x8x1xf32> -> vector<1x8x1xf32>
    %23 = vector.broadcast %22 : vector<1x8x1xf32> to vector<1x8x8xf32>
    %24 = arith.mulf %19, %23 : vector<1x8x8xf32>
    %25 = arith.truncf %24 : vector<1x8x8xf32> to vector<1x8x8xbf16>
    %cst_9 = arith.constant dense<0.000000e+00> : vector<1x8x128xf32>
    %26 = tpu.matmul %25, %10, %cst_9 {dimension_numbers = #tpu.dot_dimension_numbers<[2], [1], [1], [2], [0, 0, 0, 1, 1, 2], [0], [0]>} : vector<1x8x8xbf16>, vector<1x8x128xbf16>, vector<1x8x128xf32> -> vector<1x8x128xf32>
    %c0_10 = arith.constant 0 : index
    %c0_11 = arith.constant 0 : index
    %c0_12 = arith.constant 0 : index
    %27 = vector.load %arg4[%c0_10, %c0_11, %c0_12] : memref<1x8x128xf32, #tpu.memory_space<vmem>>, vector<1x8x128xf32>
    tpu.vector_store %arg4[%c0_10, %c0_11, %c0_12], %26 {strides = array<i32>} : memref<1x8x128xf32, #tpu.memory_space<vmem>>, vector<1x8x128xf32>,
    return
  }
  func.func @transform_0(%arg0: i32) -> (i32, i32, i32) {
    %c0_i32 = arith.constant 0 : i32
    %c0_i32_0 = arith.constant 0 : i32
    %c0_i32_1 = arith.constant 0 : i32
    return %arg0, %c0_i32, %c0_i32_0 : i32, i32, i32
  }
  func.func @transform_1(%arg0: i32) -> (i32, i32) {
    %c0_i32 = arith.constant 0 : i32
    %c0_i32_0 = arith.constant 0 : i32
    %c0_i32_1 = arith.constant 0 : i32
    return %c0_i32, %c0_i32_0 : i32, i32
  }
  func.func @transform_2(%arg0: i32) -> (i32, i32) {
    %c0_i32 = arith.constant 0 : i32
    %c0_i32_0 = arith.constant 0 : i32
    %c0_i32_1 = arith.constant 0 : i32
    return %c0_i32, %c0_i32_0 : i32, i32
  }
  func.func @transform_3(%arg0: i32) -> (i32, i32, i32) {
    %c0_i32 = arith.constant 0 : i32
    %c0_i32_0 = arith.constant 0 : i32
    %c0_i32_1 = arith.constant 0 : i32
    return %arg0, %c0_i32, %c0_i32_0 : i32, i32, i32
  }
}

</mosaic_0001>

<bundles_post_ra>
// kernel: tpu_custom_call.1
= control target key start
LH: loop header
LB: loop body
LE: loop exit
PB: predicated region body
PF: predicated region fallthrough
CT: control target
= control target key end

     0   :  { %8 = vsyncpa [#allocation3], 0  ;;  %s1784_s0 = inlined_call_operand.hbm [shape: bf16[2,8,384], index: 0, kind: input, shape index: {}]   ;;  %s1785_s1 = inlined_call_operand.hbm [shape: bf16[384,384], index: 1, kind: input, shape index: {}]   ;;  %s1786_s2 = inlined_call_operand.hbm [shape: f32[8,8], index: 2, kind: input, shape index: {}]   ;;  %s1787_s3 = inlined_call_operand.hbm [shape: f32[2,8,128], index: 3, kind: output, shape index: {}]  }
   0x1   :  { %10 = vsyncpa [#allocation3 + $0x1], 0 }
   0x2   :  { %11 = vsyncpa [#allocation6], 0 }
   0x3   :  { %12 = vsyncpa [#allocation4], 0 }
   0x4   :  { %14 = vsyncpa [#allocation4 + $0x1], 0  ;;  %s1592_s12 = smov 0   ;;  %s1594_s13 = smov 0  }
   0x5   :  { %s1596_s14 = smov 0   ;;  %s1598_s15 = smov 0  }
   0x6 LB: > { %s1613_s16 = sadd.s32 4294967295, %s1561_s15   ;;  %s1078_s17 = sadd.s32 4294967294, %s1561_s15   ;;  %s1561_s15 = sphi %s1598_s15, %s1809_s15   ;;  %s1557_s14 = sphi %s1596_s14, %s1808_s14   ;;  %s1553_s13 = sphi %s1594_s13, %s1807_s13   ;;  %s1549_s12 = sphi %s1592_s12, %s1806_s12  }
   0x7   : > { %p40_p0 = scmp.ne.s32.totalorder %s1553_s13, %s1549_s12  ;;  %p1788_p1 = scmp.eq.s32.totalorder %s1613_s16, 0 }
   0x8   : > { %p112_p3 = scmp.eq.s32.totalorder %s1078_s17, 1  ;;  %p1079_p5 = scmp.ge.s32.totalorder %s1561_s15, 1 }
   0x9   : > { %p1622_p4 = por %p1788_p1, %p40_p0  ;;  %p119_p7 = scmp.lt.s32.totalorder %s1561_s15, 3 }
   0xa   : > { %p1627_p6 = por %p112_p3, %p40_p0  ;;  %s1563_s21 = smov [#allocation5]  }
   0xb   : > { %s1792_s18 = scalar_select %p1622_p4, 1, 0 }
   0xc   : > { %s1793_s19 = scalar_select %p1627_p6, 1, 0 }
   0xd   : > { %p1632_p8 = pnand %p1079_p5, %p119_p7  ;;  %s131_s22 = sshll.u32 %s1563_s21, 4  ;;  %s132_s22 = int_to_ptr.vmem [resolvable:$true] %s131_s22 }
   0xe   : > { %s1564_s24 = smov [#allocation7]   ;;  %s1424_s26 = scalar_lea.vmem %s132_s22, 9216 }
   0xf   : > { %s1794_s20 = scalar_select %p1632_p8, 1, 0 }
  0x10   : > { %p1250_p9 = pneg %p1632_p8  ;;  %s145_s25 = sshll.u32 %s1564_s24, 4  ;;  %s146_s25 = int_to_ptr.vmem [resolvable:$true] %s145_s25 }
  0x11   : > { %p1425_p13 = scmp.ne.s32.totalorder %s132_s22, %s1424_s26  ;;  %p1432_p5 = scmp.lt.s32.totalorder %s132_s22, %s132_s22 }
  0x12   : > { %p1641_p11 = pnand %p1250_p9, %p1788_p1  ;;  %p1433_p7 = scmp.lt.s32.totalorder %s1424_s26, %s1424_s26 }
  0x14   : > { %p1415_p12 = pneg %p1641_p11  ;;  %p1434_p10 = por %p1433_p7, %p1432_p5 }
  0x16   : > { %p1427_p0 = pnand %p1425_p13, %p1415_p12 }
  0x18   : > { %p1428_p3 = pneg %p1427_p0 }
  0x1a   : > { %p1435_p9 = pnand %p1434_p10, %p1428_p3 }
  0x1c   : > { %1438 = shalt.err (!%p1435_p9)
}
  0x1d   : > { %s1565_s27 = smov 192   ;;  %s1566_s28 = smov 12  }
  0x1e   : > { %1253 = dma.hbm_to_vmem [thread:$0]  (!%p1641_p11), %s1785_s1, 9216, %s132_s22, [#allocation6], %s1565_s27, %s1565_s27, %s1566_s28  }
  0x1f   : > { %s1450_s4 = scalar_lea.vmem %s146_s25, 128  ;;  %p1458_p2 = scmp.lt.s32.totalorder %s146_s25, %s146_s25 }
  0x20   : > { %p1451_p1 = scmp.ne.s32.totalorder %s146_s25, %s1450_s4  ;;  %p1459_p6 = scmp.lt.s32.totalorder %s1450_s4, %s1450_s4 }
  0x22   : > { %p1453_p13 = pnand %p1451_p1, %p1415_p12  ;;  %p1460_p5 = por %p1459_p6, %p1458_p2 }
  0x24   : > { %p1454_p0 = pneg %p1453_p13 }
  0x26   : > { %p1461_p10 = pnand %p1460_p5, %p1454_p0 }
  0x28   : > { %1464 = shalt.err (!%p1461_p10)
}
  0x29   : > { %1256 = dma.hbm_to_vmem [thread:$0]  (!%p1641_p11), %s1786_s2, 128, %s146_s25, [#allocation6]  }
  0x2a   : > { %s1664_s7 = sadd.s32 1, %s1561_s15   ;;  %s27_s8 = sadd.s32 1, %s1557_s14 }
  0x2b   : > { %s24_s9 = ssub.s32 %s1561_s15, %s1664_s7  ;;  %p34_p1 = scmp.ne.s32.totalorder %s1557_s14, %s1553_s13 }
  0x2c   : > { %p25_p2 = scmp.eq.s32.totalorder %s24_s9, 0  ;;  %p35_p6 = scmp.eq.s32.totalorder %s1561_s15, 0 }
  0x2d   : > { %p1796_p12 = scmp.eq.s32.totalorder %s1613_s16, 1  ;;  %p1267_p7 = scmp.lt.s32.totalorder %s1561_s15, 2 }
  0x2e   : > { %s1680_s11 = scalar_select %p25_p2, %s1557_s14, %s27_s8  }
  0x2f   : > { %p1674_p3 = por %p1796_p12, %p34_p1  ;;  %p36_p9 = por %p35_p6, %p34_p1 }
  0x30   : > { %s156_s17 = sand.u32 1, %s1557_s14   ;;  %s1236_s22 = smul.u32 192, %s1561_s15 }
  0x31   : > { %s1797_s10 = scalar_select %p1674_p3, 1, 0 }
  0x32   : > { %s1235_s21 = smul.u32 12, %s156_s17  ;;  %p1684_p11 = pnand %p1267_p7, %p36_p9 }
  0x33   : > { %s1691_s26 = scalar_lea.hbm %s1784_s0, %s1236_s22  ;;  %s157_s29 = scalar_lea.sflag [#allocation3], %s156_s17 }
  0x34   : > { %s160_s27 = scalar_lea.vmem [#allocation2], %s1235_s21  ;;  %s1465_s30 = scalar_lea.hbm %s1691_s26, 192 }
  0x35   : > { %s168_s28 = sshll.u32 %s160_s27, 4  ;;  %p1466_p13 = scmp.ne.s32.totalorder %s1691_s26, %s1465_s30  ;;  %s169_s28 = int_to_ptr.vmem [resolvable:$true] %s168_s28 }
  0x36   : > { %p1467_p0 = pneg %p1684_p11  ;;  %s1470_s6 = scalar_lea.hbm %s1784_s0, 384 }
  0x37   : > { %p1471_p1 = scmp.lt.s32.totalorder %s1691_s26, %s1784_s0  ;;  %p1472_p2 = scmp.lt.s32.totalorder %s1470_s6, %s1465_s30 }
  0x38   : > { %p1468_p5 = pnand %p1467_p0, %p1466_p13 }
  0x39   : > { %p1473_p6 = por %p1472_p2, %p1471_p1 }
  0x3a   : > { %p1469_p10 = pneg %p1468_p5 }
  0x3c   : > { %p1474_p12 = pnand %p1473_p6, %p1469_p10 }
  0x3e   : > { %1477 = shalt.err (!%p1474_p12)
}
  0x3f   : > { %s1478_s21 = scalar_lea.vmem %s169_s28, 192  ;;  %s1567_s17 = smov [#allocation2]  }
  0x40   : > { %p1479_p7 = scmp.ne.s32.totalorder %s169_s28, %s1478_s21  ;;  %s1483_s22 = sshll.u32 %s1567_s17, 4  ;;  %s1484_s22 = int_to_ptr.vmem [resolvable:$false] %s1483_s22 }
  0x41   : > { %s1485_s24 = scalar_lea.vmem %s1484_s22, 384  ;;  %p1486_p13 = scmp.lt.s32.totalorder %s169_s28, %s1484_s22 }
  0x42   : > { %p1481_p9 = pnand %p1479_p7, %p1467_p0  ;;  %p1487_p5 = scmp.lt.s32.totalorder %s1485_s24, %s1478_s21 }
  0x44   : > { %p1482_p3 = pneg %p1481_p9  ;;  %p1488_p4 = por %p1487_p5, %p1486_p13 }
  0x46   : > { %p1489_p8 = pnand %p1488_p4, %p1482_p3 }
  0x48   : > { %1492 = shalt.err (!%p1489_p8)
}
  0x49   : > { %1260 = dma.hbm_to_vmem [thread:$0]  (!%p1684_p11), %s1691_s26, 192, %s169_s28, %s157_s29  }
  0x4a   : > { %p1799_p10 = scmp.ne.s32.totalorder %s1794_s20, 0 }
  0x4b   : > { %s1710_s25 = sand.u32 (!%p1799_p10), 1, %s1553_s13   ;;  %p1800_p0 = scmp.ne.s32.totalorder (!%p1799_p10), %s1792_s18, 0 }
  0x4c   : > { %177 = sbr.rel (%p1799_p10) target bundleno = 1074 (0x432), region = 32  ;;  %s180_s30 = scalar_lea.sflag (!%p1799_p10), [#allocation3], %s1710_s25 }
  0x4d   : > { %s1237_s27 = smul.u32 (!%p1799_p10), 12, %s1710_s25 }
  0x4f   : > { %s1714_s4 = scalar_lea.vmem (!%p1799_p10), [#allocation2], %s1237_s27 }
  0x51   : > { %1536 = dma.done.wait (%p1800_p0), %s180_s30, 192  }
  0x52   : > { %1538 = vsyncadd (%p1800_p0), %s180_s30, 4294967104  ;;  %p1801_p4 = scmp.eq.s32.totalorder %s1613_s16, 0 }
  0x54   : > { %1540 = dma.done.wait (%p1801_p4), [#allocation6], 9344   ;;  %p1802_p8 = pmov %p1801_p4 }
  0x55   : > { %v1568_v0 = vmov 0   ;;  %v1310_v1 = vld [vmem:[#allocation5 + $0xac] ss:$12 sps:$4 sm:$0xff]   ;;  %v1312_v2 = vld [vmem:[#allocation5 + $0xa8] ss:$12 sps:$4 sm:$0xff]   ;;  %vm1570_vm0 = vmmov 0  }
  0x56   : > { %1542 = vsyncadd (%p1802_p8), [#allocation6], 4294957952  ;;  %781 = vmatprep.mubr.bf16.mxu1 %v1568_v0  ;;  %708 = vmatprep.subr.bf16.mxu0 %v1310_v1  ;;  %v1313_v3 = vld [vmem:[#allocation5 + $0x94] ss:$12 sps:$4 sm:$0xff]   ;;  %v1315_v4 = vld [vmem:[#allocation5 + $0x90] ss:$12 sps:$4 sm:$0xff]  }
  0x57   : > { %709 = vmatpush1.bf16.msra.mxu0 %v1312_v2  ;;  %v1316_v5 = vld [vmem:[#allocation5 + $0x7c] ss:$12 sps:$4 sm:$0xff]   ;;  %v1318_v6 = vld [vmem:[#allocation5 + $0x78] ss:$12 sps:$4 sm:$0xff]   ;;  %v1321_v10 = vld [vmem:[#allocation5 + $0x60] ss:$12 sps:$4 sm:$0xff]  }
  0x58   : > { %710 = vmatprep.subr.bf16.mxu0 %v1313_v3  ;;  %v1319_v7 = vld [vmem:[#allocation5 + $0x64] ss:$12 sps:$4 sm:$0xff]   ;;  %v1331_v8 = vld [vmem:[#allocation5 + $0x22c] ss:$12 sps:$4 sm:$0xff]   ;;  %v1333_v9 = vld [vmem:[#allocation5 + $0x228] ss:$12 sps:$4 sm:$0xff]  }
  0x59   : > { %v1322_v11 = vld [vmem:[#allocation5 + $0x4c] ss:$12 sps:$4 sm:$0xff]   ;;  %749 = vmatprep.subr.bf16.mxu1 %v1331_v8  ;;  %v1337_v12 = vld [vmem:[#allocation5 + $0x214] ss:$12 sps:$4 sm:$0xff]   ;;  %v1339_v13 = vld [vmem:[#allocation5 + $0x210] ss:$12 sps:$4 sm:$0xff]  }
  0x5a   : > { %750 = vmatpush1.bf16.msra.mxu1 %v1333_v9  ;;  %v1324_v14 = vld [vmem:[#allocation5 + $0x48] ss:$12 sps:$4 sm:$0xff]   ;;  %v1345_v17 = vld [vmem:[#allocation5 + $0x1f8] ss:$12 sps:$4 sm:$0xff]   ;;  %v1327_v19 = vld [vmem:[#allocation5 + $0x30] ss:$12 sps:$4 sm:$0xff]  }
  0x5b   : > { %711 = vmatpush1.bf16.msra.mxu0 %v1315_v4  ;;  %751 = vmatprep.subr.bf16.mxu1 %v1337_v12  ;;  %v1343_v15 = vld [vmem:[#allocation5 + $0x1fc] ss:$12 sps:$4 sm:$0xff]   ;;  %v1325_v16 = vld [vmem:[#allocation5 + $0x34] ss:$12 sps:$4 sm:$0xff]   ;;  %v1349_v18 = vld [vmem:[#allocation5 + $0x1e4] ss:$12 sps:$4 sm:$0xff]  }
  0x5c   : > { %712 = vmatprep.subr.bf16.mxu0 %v1316_v5  ;;  %v1328_v20 = vld [vmem:[#allocation5 + $0x1c] ss:$12 sps:$4 sm:$0xff]   ;;  %v1351_v21 = vld [vmem:[#allocation5 + $0x1e0] ss:$12 sps:$4 sm:$0xff]   ;;  %v1330_v23 = vld [vmem:[#allocation5 + $0x18] ss:$12 sps:$4 sm:$0xff]  }
  0x5d   : > { %v1355_v22 = vld [vmem:[#allocation5 + $0x1cc] ss:$12 sps:$4 sm:$0xff]   ;;  %v1334_v24 = vld [vmem:[#allocation5 + $0x4] ss:$12 sps:$4 sm:$0xff]   ;;  %v1357_v25 = vld [vmem:[#allocation5 + $0x1c8] ss:$12 sps:$4 sm:$0xff]  }
  0x5e   : > { %752 = vmatpush1.bf16.msra.mxu1 %v1339_v13  ;;  %v1361_v26 = vld [vmem:[#allocation5 + $0x1b4] ss:$12 sps:$4 sm:$0xff]   ;;  %v1340_v28 = vld [vmem:[#allocation5 + $0x16c] ss:$12 sps:$4 sm:$0xff]   ;;  %v1363_v29 = vld [vmem:[#allocation5 + $0x1b0] ss:$12 sps:$4 sm:$0xff]  }
  0x5f   : > { %713 = vmatpush1.bf16.msra.mxu0 %v1318_v6  ;;  %753 = vmatprep.subr.bf16.mxu1 %v1343_v15  ;;  %v1336_v27 = vld [vmem:[#allocation5] ss:$12 sps:$4 sm:$0xff]   ;;  %v1367_v30 = vld [vmem:[#allocation5 + $0x19c] ss:$12 sps:$4 sm:$0xff]   ;;  %v1369_v34 = vld [vmem:[#allocation5 + $0x198] ss:$12 sps:$4 sm:$0xff]  }
  0x60   : > { %714 = vmatprep.subr.bf16.mxu0 %v1319_v7  ;;  %v1342_v31 = vld [vmem:[#allocation5 + $0x168] ss:$12 sps:$4 sm:$0xff]   ;;  %v1373_v36 = vld [vmem:[#allocation5 + $0x184] ss:$12 sps:$4 sm:$0xff]   ;;  %v1375_v40 = vld [vmem:[#allocation5 + $0x180] ss:$12 sps:$4 sm:$0xff]  }
  0x61   : > { %v1346_v32 = vld [vmem:[#allocation5 + $0x154] ss:$12 sps:$4 sm:$0xff]   ;;  %v1348_v37 = vld [vmem:[#allocation5 + $0x150] ss:$12 sps:$4 sm:$0xff]   ;;  %v1354_v39 = vld [vmem:[#allocation5 + $0x138] ss:$12 sps:$4 sm:$0xff]  }
  0x62   : > { %754 = vmatpush1.bf16.msra.mxu1 %v1345_v17  ;;  %v215_v33 = vld [vmem:[%s1714_s4] sm:$0xff]  ;;  %v1385_v41 = vld [vmem:[#allocation5 + $0x170] ss:$12 sps:$4 sm:$0xff]   ;;  %v1569_v3 = vmov 0.0   ;;  %vm930_vm1 = vcmask 1043456   ;;  %vm914_vm2 = vcmask 64512  }
  0x63   : > { %715 = vmatpush1.bf16.msra.mxu0 %v1321_v10  ;;  %755 = vmatprep.subr.bf16.mxu1 %v1349_v18  ;;  %v1089_v35 = vcombine.high %v215_v33, %v215_v33  ;;  %v1352_v38 = vld [vmem:[#allocation5 + $0x13c] ss:$12 sps:$4 sm:$0xff]   ;;  %v1358_v42 = vld [vmem:[#allocation5 + $0x124] ss:$12 sps:$4 sm:$0xff]   ;;  %v1360_v46 = vld [vmem:[#allocation5 + $0x120] ss:$12 sps:$4 sm:$0xff]   ;;  %v1088_v0 = vcombine.low %v215_v33, %v215_v33 }
  0x64   : > { %716 = vmatprep.subr.bf16.mxu0 %v1322_v11  ;;  %v1726_v43 = vld [vmem:[%s1714_s4 + $0x8] ss:$0 sps:$4 sm:$0xff]   ;;  %v1387_v45 = vld [vmem:[#allocation5 + $0x158] ss:$12 sps:$4 sm:$0xff]   ;;  %v1366_v48 = vld [vmem:[#allocation5 + $0x108] ss:$12 sps:$4 sm:$0xff]  }
  0x65   : > { %740 = vmatprep.mubr.bf16.mxu0 %v1089_v35  ;;  %v1386_v44 = vld [vmem:[#allocation5 + $0xb0] ss:$12 sps:$4 sm:$0xff]   ;;  %v1364_v47 = vld [vmem:[#allocation5 + $0x10c] ss:$12 sps:$4 sm:$0xff]   ;;  %v1370_v51 = vld [vmem:[#allocation5 + $0xf4] ss:$12 sps:$4 sm:$0xff]  }
  0x66   : > { %756 = vmatpush1.bf16.msra.mxu1 %v1351_v21  ;;  %v1388_v49 = vld [vmem:[#allocation5 + $0x98] ss:$12 sps:$4 sm:$0xff]   ;;  %v1389_v50 = vld [vmem:[#allocation5 + $0x140] ss:$12 sps:$4 sm:$0xff]   ;;  %v1372_v53 = vld [vmem:[#allocation5 + $0xf0] ss:$12 sps:$4 sm:$0xff]  }
  0x67   : > { %717 = vmatpush1.bf16.msra.mxu0 %v1324_v14  ;;  %757 = vmatprep.subr.bf16.mxu1 %v1355_v22  ;;  %v1390_v52 = vld [vmem:[#allocation5 + $0x80] ss:$12 sps:$4 sm:$0xff]   ;;  %v1392_v54 = vld [vmem:[#allocation5 + $0x128] ss:$12 sps:$4 sm:$0xff]   ;;  %v1395_v57 = vld [vmem:[#allocation5 + $0x110] ss:$12 sps:$4 sm:$0xff]  }
  0x68   : > { %718 = vmatprep.subr.bf16.mxu0 %v1325_v16  ;;  %v1376_v55 = vld [vmem:[#allocation5 + $0xdc] ss:$12 sps:$4 sm:$0xff]   ;;  %v1378_v58 = vld [vmem:[#allocation5 + $0xd8] ss:$12 sps:$4 sm:$0xff]   ;;  %v1382_v62 = vld [vmem:[#allocation5 + $0xc0] ss:$12 sps:$4 sm:$0xff]  }
  0x69   : > { %v1393_v56 = vld [vmem:[#allocation5 + $0x68] ss:$12 sps:$4 sm:$0xff]   ;;  %v1380_v59 = vld [vmem:[#allocation5 + $0xc4] ss:$12 sps:$4 sm:$0xff]   ;;  %v1401_v1 = vld [vmem:[#allocation5 + $0xe0] ss:$12 sps:$4 sm:$0xff]  }
  0x6a   : > { %758 = vmatpush1.bf16.msra.mxu1 %v1357_v25  ;;  %v1396_v60 = vld [vmem:[#allocation5 + $0x50] ss:$12 sps:$4 sm:$0xff]   ;;  %v1398_v61 = vld [vmem:[#allocation5 + $0xf8] ss:$12 sps:$4 sm:$0xff]   ;;  %v1397_v5 = vld [vmem:[#allocation5 + $0x200] ss:$12 sps:$4 sm:$0xff]  }
  0x6b   : > { %719 = vmatpush1.bf16.msra.mxu0 %v1327_v19  ;;  %759 = vmatprep.subr.bf16.mxu1 %v1361_v26  ;;  %v1399_v63 = vld [vmem:[#allocation5 + $0x38] ss:$12 sps:$4 sm:$0xff]   ;;  %v1391_v2 = vld [vmem:[#allocation5 + $0x230] ss:$12 sps:$4 sm:$0xff]   ;;  %v1400_v6 = vld [vmem:[#allocation5 + $0x1e8] ss:$12 sps:$4 sm:$0xff]  }
  0x6c   : > { %720 = vmatprep.subr.bf16.mxu0 %v1328_v20  ;;  %v1394_v4 = vld [vmem:[#allocation5 + $0x218] ss:$12 sps:$4 sm:$0xff]   ;;  %v1402_v7 = vld [vmem:[#allocation5 + $0x20] ss:$12 sps:$4 sm:$0xff]   ;;  %v1403_v8 = vld [vmem:[#allocation5 + $0x1d0] ss:$12 sps:$4 sm:$0xff]  }
  0x6d   : > { %v1404_v9 = vld [vmem:[#allocation5 + $0xc8] ss:$12 sps:$4 sm:$0xff]   ;;  %v1406_v11 = vld [vmem:[#allocation5 + $0x1b8] ss:$12 sps:$4 sm:$0xff]   ;;  %v1407_v12 = vld [vmem:[#allocation5 + $0x1a0] ss:$12 sps:$4 sm:$0xff]  }
  0x6e   : > { %760 = vmatpush1.bf16.msra.mxu1 %v1363_v29  ;;  %v1405_v10 = vld [vmem:[#allocation5 + $0x8] ss:$12 sps:$4 sm:$0xff]   ;;  %s1087_s18 = sshll.u32 %s1710_s25, 3  ;;  %s1165_s26 = sshll.u32 %s1613_s16, 7 }
  0x6f   : > { %721 = vmatpush1.bf16.msra.mxu0 %v1330_v23  ;;  %761 = vmatprep.subr.bf16.mxu1 %v1367_v30  ;;  %v1408_v13 = vld [vmem:[#allocation5 + $0x188] ss:$12 sps:$4 sm:$0xff]   ;;  %s213_s20 = scalar_lea.vmem [#allocation8], %s1087_s18  ;;  %s1743_s5 = scalar_lea.hbm %s1787_s3, %s1165_s26 }
  0x70   : > { %722 = vmatprep.subr.bf16.mxu0 %v1334_v24  ;;  %s989_s23 = sshll.u32 %s213_s20, 4  ;;  %s976_s6 = scalar_lea.sflag [#allocation4], %s1710_s25  ;;  %s1738_s23 = int_to_ptr.vmem [resolvable:$true] %s989_s23 }
  0x71   : > { %s1493_s8 = scalar_lea.vmem %s1738_s23, 128  ;;  %p1803_p11 = scmp.ne.s32.totalorder %s1797_s10, 0 }
  0x72   : > { %762 = vmatpush1.bf16.msra.mxu1 %v1369_v34  ;;  %p1494_p3 = scmp.ne.s32.totalorder %s1738_s23, %s1493_s8  ;;  %s1571_s16 = smov [#allocation8]  }
  0x73   : > { %723 = vmatpush1.bf16.msra.mxu0 %v1336_v27  ;;  %763 = vmatprep.subr.bf16.mxu1 %v1373_v36  ;;  %s1497_s9 = sshll.u32 %s1571_s16, 4  ;;  %s1498_s9 = int_to_ptr.vmem [resolvable:$false] %s1497_s9 }
  0x74   : > { %724 = vmatprep.subr.bf16.mxu0 %v1340_v28  ;;  %p1495_p1 = pnand %p1494_p3, %p1803_p11  ;;  %s1499_s21 = scalar_lea.vmem %s1498_s9, 256 }
  0x75   : > { %p1500_p6 = scmp.lt.s32.totalorder %s1738_s23, %s1498_s9  ;;  %p1501_p12 = scmp.lt.s32.totalorder %s1499_s21, %s1493_s8 }
  0x76   : > { %764 = vmatpush1.bf16.msra.mxu1 %v1375_v40  ;;  %p1496_p2 = pneg %p1495_p1 }
  0x77   : > { %725 = vmatpush2.bf16.msra.mxu0 %v1342_v31  ;;  %1168 = vmatprep.subr.bf16.mxu1 %v1385_v41  ;;  %p1502_p7 = por %p1501_p12, %p1500_p6 }
  0x78   : > { %726 = vmatprep.subr.bf16.mxu0 %v1346_v32 }
  0x79   : > { %782 = vmatmul.mubr.bf16.vlgmr.msra.gmra.mxu1 %v1726_v43  ;;  %p1503_p9 = pnand %p1502_p7, %p1496_p2 }
  0x7a   : > { %1169 = vmatpush3.bf16.msra.mxu1 %v1386_v44  ;;  %822 = vmatprep.mubr.bf16.mxu1 %v1089_v35 }
  0x7b   : > { %727 = vmatpush2.bf16.msra.mxu0 %v1348_v37  ;;  %1170 = vmatprep.subr.bf16.mxu1 %v1387_v45 }
  0x7c   : > { %728 = vmatprep.subr.bf16.mxu0 %v1352_v38  ;;  %v873_v38 = vld [vmem:[#allocation7] sm:$0xff] }
  0x7e   : > { %1171 = vmatpush3.bf16.msra.mxu1 %v1388_v49 }
  0x7f   : > { %729 = vmatpush2.bf16.msra.mxu0 %v1354_v39  ;;  %1172 = vmatprep.subr.bf16.mxu1 %v1389_v50 }
  0x80   : > { %730 = vmatprep.subr.bf16.mxu0 %v1358_v42 }
  0x82   : > { %1173 = vmatpush3.bf16.msra.mxu1 %v1390_v52 }
  0x83   : > { %731 = vmatpush2.bf16.msra.mxu0 %v1360_v46  ;;  %1174 = vmatprep.subr.bf16.mxu1 %v1392_v54 }
  0x84   : > { %732 = vmatprep.subr.bf16.mxu0 %v1364_v47 }
  0x86   : > { %1175 = vmatpush3.bf16.msra.mxu1 %v1393_v56 }
  0x87   : > { %733 = vmatpush2.bf16.msra.mxu0 %v1366_v48  ;;  %1176 = vmatprep.subr.bf16.mxu1 %v1395_v57 }
  0x88   : > { %734 = vmatprep.subr.bf16.mxu0 %v1370_v51 }
  0x8a   : > { %1177 = vmatpush3.bf16.msra.mxu1 %v1396_v60 }
  0x8b   : > { %735 = vmatpush2.bf16.msra.mxu0 %v1372_v53  ;;  %1178 = vmatprep.subr.bf16.mxu1 %v1398_v61 }
  0x8c   : > { %736 = vmatprep.subr.bf16.mxu0 %v1376_v55 }
  0x8e   : > { %1179 = vmatpush3.bf16.msra.mxu1 %v1399_v63 }
  0x8f   : > { %737 = vmatpush2.bf16.msra.mxu0 %v1378_v58  ;;  %1180 = vmatprep.subr.bf16.mxu1 %v1401_v1 }
  0x90   : > { %738 = vmatprep.subr.bf16.mxu0 %v1380_v59 }
  0x92   : > { %1181 = vmatpush3.bf16.msra.mxu1 %v1402_v7 }
  0x93   : > { %739 = vmatpush2.bf16.msra.mxu0 %v1382_v62  ;;  %1182 = vmatprep.subr.bf16.mxu1 %v1404_v9 }
  0x94   : > { %1203 = vmatprep.subr.bf16.mxu0 %v1569_v3 }
  0x96   : > { %741 = vmatmul.mubr.bf16.vlgmr.msra.gmra.mxu0 %v1088_v0  ;;  %1183 = vmatpush3.bf16.msra.mxu1 %v1405_v10 }
  0x97   : > { %1204 = vmatpush3.bf16.msra.mxu0 %v1391_v2  ;;  %1223 = vmatprep.subr.bf16.mxu1 %v1569_v3 }
  0x98   : > { %1205 = vmatprep.subr.bf16.mxu0 %v1569_v3  ;;  %1219 = vmatprep.mubr.msk.bf16.mxu0 %vm1570_vm0, %v1569_v3 }
  0x99   : > { %823 = vmatmul.mubr.bf16.vlgmr.msra.gmra.mxu1 %v1088_v0 }
  0x9a   : > { %1225 = vmatprep.mubr.msk.bf16.mxu1 %vm1570_vm0, %v1569_v3 }
  0x9b   : > { %1206 = vmatpush3.bf16.msra.mxu0 %v1394_v4 }
  0x9c   : > { %1207 = vmatprep.subr.bf16.mxu0 %v1569_v3 }
  0x9f   : > { %1208 = vmatpush3.bf16.msra.mxu0 %v1397_v5 }
  0xa0   : > { %1209 = vmatprep.subr.bf16.mxu0 %v1569_v3 }
  0xa3   : > { %1210 = vmatpush3.bf16.msra.mxu0 %v1400_v6 }
  0xa4   : > { %1211 = vmatprep.subr.bf16.mxu0 %v1569_v3 }
  0xa7   : > { %1212 = vmatpush3.bf16.msra.mxu0 %v1403_v8 }
  0xa8   : > { %1213 = vmatprep.subr.bf16.mxu0 %v1569_v3 }
  0xab   : > { %1214 = vmatpush3.bf16.msra.mxu0 %v1406_v11 }
  0xac   : > { %1215 = vmatprep.subr.bf16.mxu0 %v1569_v3 }
  0xaf   : > { %1216 = vmatpush3.bf16.msra.mxu0 %v1407_v12 }
  0xb0   : > { %1217 = vmatprep.subr.bf16.mxu0 %v1569_v3 }
  0xb3   : > { %1218 = vmatpush3.bf16.msra.mxu0 %v1408_v13 }
  0xb6   : > { %1220 = vmatmul.mubr.bf16.vlgmr.msra.gmra.mxu0 %v1726_v43 }
 0x139   : > { %v783_v14 = vpop.f32.mrf.mxu1 }
 0x13b   : > { %v785_v15 = vpop.f32.mrf.mxu1 }
 0x13d   : > { %v787_v16 = vpop.f32.mrf.mxu1 }
 0x13f   : > { %v788_v17 = vpop.f32.mrf.mxu1 }
 0x156   : > { %v742_v18 = vpop.f32.mrf.mxu0 }
 0x157   : > { %v784_v24 = vadd.f32 %v783_v14, %v742_v18 }
 0x158   : > { %v744_v19 = vpop.f32.mrf.mxu0 }
 0x159   : > { %v786_v20 = vadd.f32 %v785_v15, %v744_v19  ;;  %v870_v25 = vpack.c.bf16 %v784_v24, %v784_v24  ;;  %v1184_v26 = vpop.f32.mrf.mxu1 }
 0x15a   : > { %v746_v21 = vpop.f32.mrf.mxu0 }
 0x15b   : > { %v871_v22 = vpack.c.bf16 %v786_v20, %v786_v20  ;;  %v1185_v27 = vpop.f32.mrf.mxu1 }
 0x15c   : > { %v747_v23 = vpop.f32.mrf.mxu0  ;;  %v1186_v30 = vadd.f32 %v1185_v27, %v1184_v26 }
 0x15d   : > { %1224 = vmatpush3.bf16.xpose.msra.mxu1 %v871_v22  ;;  %v1187_v28 = vpop.f32.mrf.mxu1 }
 0x15e   : > { %1229 = vmatprep.subr.bf16.mxu1 %v1569_v3 }
 0x15f   : > { %v1188_v29 = vpop.f32.mrf.mxu1 }
 0x164   : > { %1226 = vmatmul.mubr.bf16.vlgmr.msra.gmra.mxu1 %v870_v25 }
 0x165   : > { %1231 = vmatprep.mubr.msk.bf16.mxu1 %vm1570_vm0, %v1569_v3 }
 0x176   : > { %v864_v31 = vpop.f32.mrf.mxu0 }
 0x177   : > { %v865_v32 = vadd.f32 %v1186_v30, %v864_v31 }
 0x178   : > { %v1221_v33 = vpop.f32.mrf.mxu0 }
 0x179   : > { %v872_v34 = vpack.c.bf16 %v865_v32, %v865_v32 }
 0x17a   : > { %v867_v35 = vpop.f32.mrf.mxu0 }
 0x17b   : > { %v932_v36 = vsel %vm930_vm1, %v872_v34, 0 }
 0x17c   : > { %1230 = vmatpush3.bf16.msra.mxu1 %v932_v36  ;;  %v1222_v37 = vpop.f32.mrf.mxu0 }
 0x224   : > { %v908_v39 = vpop.f32.mrf.mxu1 }
 0x225   : > { %v909_v40 = vadd.f32 %v908_v39, %v873_v38 }
 0x226   : > { %v1227_v41 = vpop.f32.mrf.mxu1 }
 0x227   : > { %v915_v42 = vsel %vm914_vm2, %v909_v40, -inf }
 0x228   : > { %916 = vmax.xlane.f32.xlu0 %v915_v42  ;;  %v911_v43 = vpop.f32.mrf.mxu1 }
 0x22a   : > { %v1228_v44 = vpop.f32.mrf.mxu1 }
 0x2b1   : > { %v917_v45 = vpop.xlane.xlu0 %916 }
 0x2b2   : > { %v918_v46 = vsub.f32 %v909_v40, %v917_v45 }
 0x2b4   : > { %v919_v47 = vmul.f32 1.442695, %v918_v46 }
 0x2b6   : > { %1409 = vpow2.f32 %v919_v47 }
 0x2c3   : > { %v1410_v48 = vpop.eup %1409 }
 0x2c4   : > { %v921_v49 = vsel %vm914_vm2, %v1410_v48, 0.0 }
 0x2c5   : > { %922 = vadd.xlane.f32.xlu0 %v921_v49 }
 0x34e   : > { %v923_v50 = vpop.xlane.xlu0 %922 }
 0x34f   : > { %1411 = vrcp.f32 %v923_v50 }
 0x35c   : > { %v1412_v51 = vpop.eup %1411 }
 0x35d   : > { %v925_v52 = vmul.f32 %v1412_v51, %v1410_v48 }
 0x35f   : > { %v926_v53 = vpack.c.bf16 %v925_v52, %v925_v52 }
 0x361   : > { %1232 = vmatmul.mubr.msk.bf16.vlgmr.msra.gmra.mxu1 %vm914_vm2, %v926_v53 }
 0x421   : > { %v968_v54 = vpop.f32.mrf.mxu1 }
 0x422   : > { %974 = vst [vmem:[%s213_s20] sm:$0xff] %v968_v54 }
 0x423   : > { %v1233_v55 = vpop.f32.mrf.mxu1 }
 0x424   : > { %1506 = shalt.err (!%p1503_p9)
}
 0x425   : > { %s1507_s17 = scalar_lea.hbm %s1743_s5, 128  ;;  %s1511_s25 = scalar_lea.hbm %s1787_s3, 256 }
 0x426   : > { %p1508_p13 = scmp.ne.s32.totalorder %s1743_s5, %s1507_s17  ;;  %p1512_p0 = scmp.lt.s32.totalorder %s1743_s5, %s1787_s3 }
 0x427   : > { %p1513_p4 = scmp.lt.s32.totalorder %s1511_s25, %s1507_s17 }
 0x428   : > { %p1509_p5 = pnand %p1508_p13, %p1803_p11 }
 0x429   : > { %p1514_p8 = por %p1513_p4, %p1512_p0 }
 0x42a   : > { %p1510_p10 = pneg %p1509_p5 }
 0x42c   : > { %p1515_p3 = pnand %p1514_p8, %p1510_p10 }
 0x42e   : > { %1518 = shalt.err (!%p1515_p3)
}
 0x42f   : > { %1248 = dma.vmem_to_hbm [thread:$0]  (%p1803_p11), %s1738_s23, 128, %s1743_s5, %s976_s6   ;;  %v971_v56 = vpop.f32.mrf.mxu1 }
 0x431   : > { %v1234_v57 = vpop.f32.mrf.mxu1 }
 0x432 PF: > { %s1001_s4 = sand.u32 1, %s1549_s12   ;;  %p1804_p1 = scmp.ne.s32.totalorder %s1793_s19, 0 }
 0x433   : > { %p1805_p2 = scmp.ge.s32.totalorder %s1561_s15, 2  ;;  %s1002_s18 = scalar_lea.sflag [#allocation4], %s1001_s4 }
 0x435   : > { %p1262_p6 = pnand %p1805_p2, %p1804_p1 }
 0x437   : > { %p1263_p12 = pneg %p1262_p6 }
 0x439   : > { %1544 = dma.done.wait (%p1263_p12), %s1002_s18, 128  }
 0x43a   : > { %1546 = vsyncadd (%p1263_p12), %s1002_s18, 4294967168  ;;  %p17_p11 = scmp.ge.s32.totalorder %s1664_s7, 4   ;;  %s1806_s12 = smov %s1553_s13 }
 0x43b   : > { %s1807_s13 = smov %s1557_s14  ;;  %s1808_s14 = smov %s1680_s11 }
 0x43c   : > { %s1809_s15 = smov %s1664_s7  ;;  %19 = sbr.rel (!%p17_p11) target bundleno = 6 (0x6), region = 85 }
 0x441   :  { %1007 = vsyncpa [#allocation3], 1 }
 0x442   :  { %1009 = vsyncpa [#allocation3 + $0x1], 1 }
 0x443   :  { %1010 = vsyncpa [#allocation6], 1 }
 0x444   :  { %1011 = vsyncpa [#allocation4], 1 }
 0x445   :  { %1013 = vsyncpa [#allocation4 + $0x1], 1 }

</bundles_post_ra>
